<compile_context>
chip_gen: v6e
topology: v6e:2x2x1
jax: 0.10.0
libtpu: 0.0.40
codegen_flags: <defaults>
</compile_context>

<pallas_src>
import jax
import jax.numpy as jnp
from jax.experimental import pallas as pl
from jax.experimental.pallas import tpu as pltpu

CLS_NB = 3
IN_DIM = 128 * CLS_NB   # 384
H1 = 512
H2 = 128                # h_dim
OUT_DIM = CLS_NB        # 3
OUT_PAD = 128           # lane-dense (padded) output width


def _round_up(n, m):
    return ((n + m - 1) // m) * m


def fusenet_kernel(x_ref, w1_ref, b1_ref, w2_ref, b2_ref, w3_ref, b3_ref, o_ref):
    # Cast x to bf16 in-kernel (VPU has slack; avoids a separate XLA cast pass
    # that would double the x HBM traffic).
    x = x_ref[...].astype(jnp.bfloat16)
    # fc1 + bias + ReLU   (dropout1 has p=0.0 -> identity)
    h = jnp.dot(x, w1_ref[...], preferred_element_type=jnp.float32)
    h = jnp.maximum(h + b1_ref[...], 0.0)
    # fc2 + bias + ReLU   (dropout2 has p=0.0 -> identity)
    h = jnp.dot(h.astype(jnp.bfloat16), w2_ref[...],
                preferred_element_type=jnp.float32)
    h = jnp.maximum(h + b2_ref[...], 0.0)
    # fc3 (logits), padded to 128 lanes for an unmasked, lane-dense bf16 store.
    o = jnp.dot(h.astype(jnp.bfloat16), w3_ref[...],
                preferred_element_type=jnp.float32) + b3_ref[...]
    o_ref[...] = o.astype(o_ref.dtype)


def prep_params(params):
    """One-time prep: PyTorch [out,in] -> [in,out], bf16 weights, f32 biases,
    fc3 zero-padded to OUT_PAD output lanes."""
    w1 = params["fc1_w"].T.astype(jnp.bfloat16)                 # [384, 512]
    b1 = params["fc1_b"].reshape(1, -1).astype(jnp.float32)     # [1, 512]
    w2 = params["fc2_w"].T.astype(jnp.bfloat16)                 # [512, 128]
    b2 = params["fc2_b"].reshape(1, -1).astype(jnp.float32)     # [1, 128]
    w3 = jnp.zeros((H2, OUT_PAD), jnp.bfloat16).at[:, :OUT_DIM].set(
        params["fc3_w"].T.astype(jnp.bfloat16))                 # [128, 128]
    b3 = jnp.zeros((1, OUT_PAD), jnp.float32).at[:, :OUT_DIM].set(
        params["fc3_b"].astype(jnp.float32))                    # [1, 128]
    return {"w1": w1, "b1": b1, "w2": w2, "b2": b2, "w3": w3, "b3": b3}


def _choose_batch_tile(B, max_tile=1024):
    """Batch tile: single grid step for small B (block covers the full batch
    dim, so no sublane-divisibility constraint); otherwise >= 4 grid steps
    (keeps both v7x TensorCores busy and x/out double-buffering effective),
    a multiple of 256 for MXU-friendly LHS panels, capped for VMEM headroom
    (fits v5e's 16 MiB scoped-VMEM default with margin)."""
    if B <= 256:
        return B
    return min(max_tile, _round_up(pl.cdiv(B, 4), 256))


def fusenet_forward(x, prepped, *, tile_b=None, max_tile=1024):
    """x: [B, IN_DIM] float32. Returns [B, OUT_DIM] float32 logits."""
    B = x.shape[0]
    tb = tile_b if tile_b is not None else _choose_batch_tile(B, max_tile)
    tb = min(tb, B)
    grid = (pl.cdiv(B, tb),)

    flops = 2 * grid[0] * tb * (IN_DIM * H1 + H1 * H2 + H2 * OUT_PAD)
    bytes_accessed = (
        B * IN_DIM * 4                                    # x (f32, read once)
        + (IN_DIM * H1 + H1 * H2 + H2 * OUT_PAD) * 2      # weights (bf16, once)
        + (H1 + H2 + OUT_PAD) * 4                         # biases (f32)
        + B * OUT_PAD * 2                                 # padded bf16 output
    )

    out_padded = pl.pallas_call(
        fusenet_kernel,
        out_shape=jax.ShapeDtypeStruct((B, OUT_PAD), jnp.bfloat16),
        grid=grid,
        in_specs=[
            pl.BlockSpec((tb, IN_DIM), lambda i: (i, 0)),      # x tile (f32)
            # Weights/biases: constant index maps -> fetched once, VMEM-resident.
            pl.BlockSpec((IN_DIM, H1), lambda i: (0, 0)),      # w1
            pl.BlockSpec((1, H1), lambda i: (0, 0)),           # b1
            pl.BlockSpec((H1, H2), lambda i: (0, 0)),          # w2
            pl.BlockSpec((1, H2), lambda i: (0, 0)),           # b2
            pl.BlockSpec((H2, OUT_PAD), lambda i: (0, 0)),     # w3 (padded)
            pl.BlockSpec((1, OUT_PAD), lambda i: (0, 0)),      # b3 (padded)
        ],
        out_specs=pl.BlockSpec((tb, OUT_PAD), lambda i: (i, 0)),
        compiler_params=pltpu.CompilerParams(
            dimension_semantics=("parallel",)),
        cost_estimate=pl.CostEstimate(
            flops=flops, transcendentals=0, bytes_accessed=bytes_accessed),
    )(x, prepped["w1"], prepped["b1"], prepped["w2"], prepped["b2"],
      prepped["w3"], prepped["b3"])

    # Tiny slice + cast; consumers that can read the padded bf16 slab directly
    # should do so and skip this pass entirely.
    return out_padded[:, :OUT_DIM].astype(jnp.float32)


def init_params(key):
    """Deterministic synthetic parameters with PyTorch nn.Linear shapes."""
    ks = jax.random.split(key, 6)

    def lin(kw, kb, out_f, in_f):
        bound = 1.0 / jnp.sqrt(in_f)
        w = jax.random.uniform(kw, (out_f, in_f), jnp.float32, -bound, bound)
        b = jax.random.uniform(kb, (out_f,), jnp.float32, -bound, bound)
        return w, b

    fc1_w, fc1_b = lin(ks[0], ks[1], H1, IN_DIM)
    fc2_w, fc2_b = lin(ks[2], ks[3], H2, H1)
    fc3_w, fc3_b = lin(ks[4], ks[5], OUT_DIM, H2)
    return {
        "fc1_w": fc1_w, "fc1_b": fc1_b,
        "fc2_w": fc2_w, "fc2_b": fc2_b,
        "fc3_w": fc3_w, "fc3_b": fc3_b,
    }


def reference_forward(x, p):
    h = jnp.maximum(x @ p["fc1_w"].T + p["fc1_b"], 0.0)
    h = jnp.maximum(h @ p["fc2_w"].T + p["fc2_b"], 0.0)
    return h @ p["fc3_w"].T + p["fc3_b"]


if __name__ == "__main__":
    key = jax.random.PRNGKey(0)
    k_params, k_x1, k_x2 = jax.random.split(key, 3)
    params = init_params(k_params)
    prepped = prep_params(params)

    # Small batch: single grid step (block covers the full batch dim).
    B1 = 8
    x1 = jax.random.normal(k_x1, (B1, IN_DIM), jnp.float32)
    out1 = jax.block_until_ready(fusenet_forward(x1, prepped))
    ref1 = reference_forward(x1, params)
    assert out1.shape == (B1, OUT_DIM)
    # bf16 matmul operands + bf16 output store, f32 accumulation -> modest
    # tolerance vs the f32 reference (original module semantics).
    assert jnp.allclose(out1, ref1, atol=5e-2, rtol=5e-2), "mismatch (B=8)"

    # Ragged-grid path: B not a multiple of the tile, multiple grid steps,
    # last block masked by Pallas (rows independent -> tail garbage discarded).
    B2 = 40
    x2 = jax.random.normal(k_x2, (B2, IN_DIM), jnp.float32)
    out2 = jax.block_until_ready(fusenet_forward(x2, prepped, tile_b=16))
    ref2 = reference_forward(x2, params)
    assert out2.shape == (B2, OUT_DIM)
    assert jnp.allclose(out2, ref2, atol=5e-2, rtol=5e-2), "mismatch (ragged)"

    print("KERNEL_OK")
</pallas_src>

<mosaic_0001>
module attributes {stable_mosaic.version = 11 : i64} {
  func.func @fusenet_kernel(%arg0: i32, %arg1: memref<8x384xf32, #tpu.memory_space<vmem>>, %arg2: memref<384x512xbf16, #tpu.memory_space<vmem>>, %arg3: memref<1x512xf32, #tpu.memory_space<vmem>>, %arg4: memref<512x128xbf16, #tpu.memory_space<vmem>>, %arg5: memref<1x128xf32, #tpu.memory_space<vmem>>, %arg6: memref<128x128xbf16, #tpu.memory_space<vmem>>, %arg7: memref<1x128xf32, #tpu.memory_space<vmem>>, %arg8: memref<8x128xbf16, #tpu.memory_space<vmem>>) attributes {dimension_semantics = [#tpu.dimension_semantics<parallel>], iteration_bounds = array<i64: 1>, scalar_prefetch = 0 : i64, scratch_operands = 0 : i64, tpu.core_type = #tpu.core_type<tc>, window_params = [{transform_indices = @transform_0, window_bounds = array<i64: 8, 384>}, {pipeline_mode = #tpu.pipeline_mode<synchronous>, transform_indices = @transform_1, window_bounds = array<i64: 384, 512>}, {pipeline_mode = #tpu.pipeline_mode<synchronous>, transform_indices = @transform_2, window_bounds = array<i64: 1, 512>}, {pipeline_mode = #tpu.pipeline_mode<synchronous>, transform_indices = @transform_3, window_bounds = array<i64: 512, 128>}, {pipeline_mode = #tpu.pipeline_mode<synchronous>, transform_indices = @transform_4, window_bounds = array<i64: 1, 128>}, {pipeline_mode = #tpu.pipeline_mode<synchronous>, transform_indices = @transform_5, window_bounds = array<i64: 128, 128>}, {pipeline_mode = #tpu.pipeline_mode<synchronous>, transform_indices = @transform_6, window_bounds = array<i64: 1, 128>}, {transform_indices = @transform_7, window_bounds = array<i64: 8, 128>}]} {
    %c0 = arith.constant 0 : index
    %c0_0 = arith.constant 0 : index
    %0 = vector.load %arg1[%c0, %c0_0] : memref<8x384xf32, #tpu.memory_space<vmem>>, vector<8x384xf32>
    %1 = arith.truncf %0 : vector<8x384xf32> to vector<8x384xbf16>
    %c0_1 = arith.constant 0 : index
    %c0_2 = arith.constant 0 : index
    %2 = vector.load %arg2[%c0_1, %c0_2] : memref<384x512xbf16, #tpu.memory_space<vmem>>, vector<384x512xbf16>
    %cst = arith.constant dense<0.000000e+00> : vector<8x512xf32>
    %3 = tpu.matmul %1, %2, %cst {dimension_numbers = #tpu.dot_dimension_numbers<[1], [0], [0], [1], [0, 0, 1, 1], [], []>} : vector<8x384xbf16>, vector<384x512xbf16>, vector<8x512xf32> -> vector<8x512xf32>
    %c0_3 = arith.constant 0 : index
    %c0_4 = arith.constant 0 : index
    %4 = vector.load %arg3[%c0_3, %c0_4] : memref<1x512xf32, #tpu.memory_space<vmem>>, vector<1x512xf32>
    %5 = vector.broadcast %4 : vector<1x512xf32> to vector<8x512xf32>
    %6 = arith.addf %3, %5 : vector<8x512xf32>
    %cst_5 = arith.constant 0.000000e+00 : f32
    %7 = vector.broadcast %cst_5 : f32 to vector<8x512xf32>
    %8 = arith.maximumf %6, %7 : vector<8x512xf32>
    %9 = arith.truncf %8 : vector<8x512xf32> to vector<8x512xbf16>
    %c0_6 = arith.constant 0 : index
    %c0_7 = arith.constant 0 : index
    %10 = vector.load %arg4[%c0_6, %c0_7] : memref<512x128xbf16, #tpu.memory_space<vmem>>, vector<512x128xbf16>
    %cst_8 = arith.constant dense<0.000000e+00> : vector<8x128xf32>
    %11 = tpu.matmul %9, %10, %cst_8 {dimension_numbers = #tpu.dot_dimension_numbers<[1], [0], [0], [1], [0, 0, 1, 1], [], []>} : vector<8x512xbf16>, vector<512x128xbf16>, vector<8x128xf32> -> vector<8x128xf32>
    %c0_9 = arith.constant 0 : index
    %c0_10 = arith.constant 0 : index
    %12 = vector.load %arg5[%c0_9, %c0_10] : memref<1x128xf32, #tpu.memory_space<vmem>>, vector<1x128xf32>
    %13 = vector.broadcast %12 : vector<1x128xf32> to vector<8x128xf32>
    %14 = arith.addf %11, %13 : vector<8x128xf32>
    %cst_11 = arith.constant 0.000000e+00 : f32
    %15 = vector.broadcast %cst_11 : f32 to vector<8x128xf32>
    %16 = arith.maximumf %14, %15 : vector<8x128xf32>
    %17 = arith.truncf %16 : vector<8x128xf32> to vector<8x128xbf16>
    %c0_12 = arith.constant 0 : index
    %c0_13 = arith.constant 0 : index
    %18 = vector.load %arg6[%c0_12, %c0_13] : memref<128x128xbf16, #tpu.memory_space<vmem>>, vector<128x128xbf16>
    %cst_14 = arith.constant dense<0.000000e+00> : vector<8x128xf32>
    %19 = tpu.matmul %17, %18, %cst_14 {dimension_numbers = #tpu.dot_dimension_numbers<[1], [0], [0], [1], [0, 0, 1, 1], [], []>} : vector<8x128xbf16>, vector<128x128xbf16>, vector<8x128xf32> -> vector<8x128xf32>
    %c0_15 = arith.constant 0 : index
    %c0_16 = arith.constant 0 : index
    %20 = vector.load %arg7[%c0_15, %c0_16] : memref<1x128xf32, #tpu.memory_space<vmem>>, vector<1x128xf32>
    %21 = vector.broadcast %20 : vector<1x128xf32> to vector<8x128xf32>
    %22 = arith.addf %19, %21 : vector<8x128xf32>
    %23 = arith.truncf %22 : vector<8x128xf32> to vector<8x128xbf16>
    %c0_17 = arith.constant 0 : index
    %c0_18 = arith.constant 0 : index
    %24 = vector.load %arg8[%c0_17, %c0_18] : memref<8x128xbf16, #tpu.memory_space<vmem>>, vector<8x128xbf16>
    tpu.vector_store %arg8[%c0_17, %c0_18], %23 {strides = array<i32>} : memref<8x128xbf16, #tpu.memory_space<vmem>>, vector<8x128xbf16>,
    return
  }
  func.func @transform_0(%arg0: i32) -> (i32, i32) {
    %c0_i32 = arith.constant 0 : i32
    %c0_i32_0 = arith.constant 0 : i32
    return %arg0, %c0_i32 : i32, i32
  }
  func.func @transform_1(%arg0: i32) -> (i32, i32) {
    %c0_i32 = arith.constant 0 : i32
    %c0_i32_0 = arith.constant 0 : i32
    %c0_i32_1 = arith.constant 0 : i32
    return %c0_i32, %c0_i32_0 : i32, i32
  }
  func.func @transform_2(%arg0: i32) -> (i32, i32) {
    %c0_i32 = arith.constant 0 : i32
    %c0_i32_0 = arith.constant 0 : i32
    %c0_i32_1 = arith.constant 0 : i32
    return %c0_i32, %c0_i32_0 : i32, i32
  }
  func.func @transform_3(%arg0: i32) -> (i32, i32) {
    %c0_i32 = arith.constant 0 : i32
    %c0_i32_0 = arith.constant 0 : i32
    %c0_i32_1 = arith.constant 0 : i32
    return %c0_i32, %c0_i32_0 : i32, i32
  }
  func.func @transform_4(%arg0: i32) -> (i32, i32) {
    %c0_i32 = arith.constant 0 : i32
    %c0_i32_0 = arith.constant 0 : i32
    %c0_i32_1 = arith.constant 0 : i32
    return %c0_i32, %c0_i32_0 : i32, i32
  }
  func.func @transform_5(%arg0: i32) -> (i32, i32) {
    %c0_i32 = arith.constant 0 : i32
    %c0_i32_0 = arith.constant 0 : i32
    %c0_i32_1 = arith.constant 0 : i32
    return %c0_i32, %c0_i32_0 : i32, i32
  }
  func.func @transform_6(%arg0: i32) -> (i32, i32) {
    %c0_i32 = arith.constant 0 : i32
    %c0_i32_0 = arith.constant 0 : i32
    %c0_i32_1 = arith.constant 0 : i32
    return %c0_i32, %c0_i32_0 : i32, i32
  }
  func.func @transform_7(%arg0: i32) -> (i32, i32) {
    %c0_i32 = arith.constant 0 : i32
    %c0_i32_0 = arith.constant 0 : i32
    return %arg0, %c0_i32 : i32, i32
  }
}

</mosaic_0001>

<bundles_post_ra>
// kernel: tpu_custom_call.1
= control target key start
LH: loop header
LB: loop body
LE: loop exit
PB: predicated region body
PF: predicated region fallthrough
CT: control target
= control target key end

     0   :  { %12 = vsyncpa [#allocation3], 0  ;;  %s1972_s0 = inlined_call_operand.hbm [shape: f32[8,384], index: 0, kind: input, shape index: {}]   ;;  %s1973_s1 = inlined_call_operand.hbm [shape: bf16[384,512], index: 1, kind: input, shape index: {}]   ;;  %s1974_s2 = inlined_call_operand.hbm [shape: f32[1,512], index: 2, kind: input, shape index: {}]   ;;  %s1975_s3 = inlined_call_operand.hbm [shape: bf16[512,128], index: 3, kind: input, shape index: {}]   ;;  %s1976_s4 = inlined_call_operand.vmem [shape: f32[1,128], index: 4, kind: input, shape index: {}]   ;;  %s1977_s5 = inlined_call_operand.hbm [shape: bf16[128,128], index: 5, kind: input, shape index: {}]   ;;  %s1978_s6 = inlined_call_operand.vmem [shape: f32[1,128], index: 6, kind: input, shape index: {}]   ;;  %s1979_s7 = inlined_call_operand.hbm [shape: bf16[8,128], index: 7, kind: output, shape index: {}]  }
   0x1   :  { %13 = vsyncpa [#allocation6], 0 }
   0x2   :  { %14 = vsyncpa [#allocation9], 0 }
   0x3   :  { %15 = vsyncpa [#allocation4], 0  ;;  %s1879_s24 = smov [#allocation5]  }
   0x4   :  { %s31_s25 = sshll.u32 %s1879_s24, 4  ;;  %s32_s25 = int_to_ptr.vmem [resolvable:$true] %s31_s25 }
   0x5   :  { %s1759_s26 = scalar_lea.vmem %s32_s25, 12288  ;;  %p1764_p1 = scmp.lt.s32.totalorder %s32_s25, %s32_s25 }
   0x6   :  { %p1760_p0 = scmp.ne.s32.totalorder %s32_s25, %s1759_s26  ;;  %p1765_p2 = scmp.lt.s32.totalorder %s1759_s26, %s1759_s26 }
   0x8   :  { %p1766_p3 = por %p1765_p2, %p1764_p1 }
   0xa   :  { %p1767_p4 = pnand %p1766_p3, %p1760_p0 }
   0xc   :  { %1770 = shalt.err (!%p1767_p4)
}
   0xd   :  { %s1880_s27 = smov 256   ;;  %s1881_s28 = smov 16  }
   0xe   :  { %37 = dma.hbm_to_vmem [thread:$0]  %s1973_s1, 12288, %s32_s25, [#allocation6], %s1880_s27, %s1880_s27, %s1881_s28  }
   0xf   :  { %s1882_s8 = smov [#allocation8]  }
  0x10   :  { %s53_s9 = sshll.u32 %s1882_s8, 4  ;;  %s54_s9 = int_to_ptr.vmem [resolvable:$true] %s53_s9 }
  0x11   :  { %s1779_s10 = scalar_lea.vmem %s54_s9, 4096  ;;  %p1784_p6 = scmp.lt.s32.totalorder %s54_s9, %s54_s9 }
  0x12   :  { %p1780_p5 = scmp.ne.s32.totalorder %s54_s9, %s1779_s10  ;;  %p1785_p7 = scmp.lt.s32.totalorder %s1779_s10, %s1779_s10 }
  0x14   :  { %p1786_p8 = por %p1785_p7, %p1784_p6 }
  0x16   :  { %p1787_p9 = pnand %p1786_p8, %p1780_p5 }
  0x18   :  { %1790 = shalt.err (!%p1787_p9)
}
  0x19   :  { %s1883_s11 = smov 64   ;;  %s1884_s12 = smov 4  }
  0x1a   :  { %59 = dma.hbm_to_vmem [thread:$0]  %s1975_s3, 4096, %s54_s9, [#allocation9], %s1883_s11, %s1883_s11, %s1884_s12  }
  0x1b   :  { %s1885_s1 = smov [#allocation2]   ;;  %s1886_s16 = smov [#allocation7]  }
  0x1c   :  { %s22_s15 = sshll.u32 %s1885_s1, 4  ;;  %s44_s17 = sshll.u32 %s1886_s16, 4  ;;  %s23_s15 = int_to_ptr.vmem [resolvable:$true] %s22_s15  ;;  %s45_s17 = int_to_ptr.vmem [resolvable:$true] %s44_s17 }
  0x1d   :  { %s1799_s18 = scalar_lea.vmem %s23_s15, 384  ;;  %p1804_p11 = scmp.lt.s32.totalorder %s23_s15, %s23_s15 }
  0x1e   :  { %p1800_p10 = scmp.ne.s32.totalorder %s23_s15, %s1799_s18  ;;  %p1805_p12 = scmp.lt.s32.totalorder %s1799_s18, %s1799_s18 }
  0x20   :  { %p1806_p13 = por %p1805_p12, %p1804_p11 }
  0x22   :  { %p1807_p0 = pnand %p1806_p13, %p1800_p10 }
  0x24   :  { %1810 = shalt.err (!%p1807_p0)
}
  0x25   :  { %25 = dma.hbm_to_vmem [thread:$0]  %s1972_s0, 384, %s23_s15, [#allocation3]  }
  0x26   :  { %s1819_s21 = scalar_lea.vmem %s45_s17, 64  ;;  %p1824_p2 = scmp.lt.s32.totalorder %s45_s17, %s45_s17 }
  0x27   :  { %p1820_p1 = scmp.ne.s32.totalorder %s45_s17, %s1819_s21  ;;  %p1825_p3 = scmp.lt.s32.totalorder %s1819_s21, %s1819_s21 }
  0x29   :  { %p1826_p4 = por %p1825_p3, %p1824_p2 }
  0x2b   :  { %p1827_p5 = pnand %p1826_p4, %p1820_p1 }
  0x2d   :  { %1830 = shalt.err (!%p1827_p5)
}
  0x2e   :  { %47 = dma.hbm_to_vmem [thread:$0]  %s1974_s2, 64, %s45_s17, [#allocation6]  }
  0x2f   :  { %s1887_s23 = smov [#allocation10]  }
  0x30   :  { %s67_s24 = sshll.u32 %s1887_s23, 4  ;;  %s68_s24 = int_to_ptr.vmem [resolvable:$true] %s67_s24 }
  0x31   :  { %s1839_s25 = scalar_lea.vmem %s68_s24, 1024  ;;  %p1844_p7 = scmp.lt.s32.totalorder %s68_s24, %s68_s24 }
  0x32   :  { %p1840_p6 = scmp.ne.s32.totalorder %s68_s24, %s1839_s25  ;;  %p1845_p8 = scmp.lt.s32.totalorder %s1839_s25, %s1839_s25 }
  0x34   :  { %p1846_p9 = por %p1845_p8, %p1844_p7 }
  0x36   :  { %p1847_p10 = pnand %p1846_p9, %p1840_p6 }
  0x38   :  { %1850 = shalt.err (!%p1847_p10)
}
  0x39   :  { %73 = dma.hbm_to_vmem [thread:$0]  %s1977_s5, 1024, %s68_s24, [#allocation9], %s1883_s11, %s1883_s11, %s1884_s12  }
  0x3a   :  { %1871 = dma.done.wait [#allocation3], 384  }
  0x3b   :  { %1872 = vsyncadd [#allocation3], 4294966912 }
  0x3c   :  { %1873 = dma.done.wait [#allocation6], 12352  }
  0x3d   :  { %1874 = vsyncadd [#allocation6], 4294954944 }
  0x3e   :  { %1875 = dma.done.wait [#allocation9], 5120  }
  0x3f   :  { %1876 = vsyncadd [#allocation9], 4294962176  ;;  %v1888_v0 = vmov 0   ;;  %v1567_v1 = vld [vmem:[#allocation5 + $0xe4] ss:$16 sps:$4 sm:$0xff]   ;;  %v94_v33 = vld [vmem:[#allocation2 + $0x10] sm:$0xff] }
  0x40   :  { %769 = vmatprep.mubr.bf16.mxu1 %v1888_v0  ;;  %v1569_v2 = vld [vmem:[#allocation5 + $0x2e4] ss:$16 sps:$4 sm:$0xff]   ;;  %696 = vmatprep.subr.bf16.mxu0 %v1567_v1  ;;  %v1571_v3 = vld [vmem:[#allocation5 + $0xe0] ss:$16 sps:$4 sm:$0xff]   ;;  %v1619_v35 = vld [vmem:[#allocation5 + $0xec] ss:$16 sps:$4 sm:$0xff]   ;;  %v1954_v36 = vpack.c.bf16 %v94_v33, %v94_v33 }
  0x41   :  { %v1572_v4 = vld [vmem:[#allocation5 + $0x2e0] ss:$16 sps:$4 sm:$0xff]   ;;  %737 = vmatprep.subr.bf16.mxu1 %v1569_v2  ;;  %v1573_v5 = vld [vmem:[#allocation5 + $0xc4] ss:$16 sps:$4 sm:$0xff]   ;;  %697 = vmatpush1.bf16.msra.mxu0 %v1571_v3  ;;  %v1617_v37 = vld [vmem:[#allocation5 + $0xe8] ss:$16 sps:$4 sm:$0xff]  }
  0x42   :  { %738 = vmatpush1.bf16.msra.mxu1 %v1572_v4  ;;  %v1575_v6 = vld [vmem:[#allocation5 + $0x2c4] ss:$16 sps:$4 sm:$0xff]   ;;  %v1577_v7 = vld [vmem:[#allocation5 + $0xc0] ss:$16 sps:$4 sm:$0xff]   ;;  %698 = vmatprep.subr.bf16.mxu0 %v1573_v5  ;;  %v1625_v40 = vld [vmem:[#allocation5 + $0xcc] ss:$16 sps:$4 sm:$0xff]  }
  0x43   :  { %v1578_v8 = vld [vmem:[#allocation5 + $0x2c0] ss:$16 sps:$4 sm:$0xff]   ;;  %739 = vmatprep.subr.bf16.mxu1 %v1575_v6  ;;  %v1579_v9 = vld [vmem:[#allocation5 + $0xa4] ss:$16 sps:$4 sm:$0xff]   ;;  %v1623_v41 = vld [vmem:[#allocation5 + $0xc8] ss:$16 sps:$4 sm:$0xff]  }
  0x44   :  { %v1581_v10 = vld [vmem:[#allocation5 + $0x2a4] ss:$16 sps:$4 sm:$0xff]   ;;  %v1583_v11 = vld [vmem:[#allocation5 + $0xa0] ss:$16 sps:$4 sm:$0xff]   ;;  %v1631_v44 = vld [vmem:[#allocation5 + $0xac] ss:$16 sps:$4 sm:$0xff]  }
  0x45   :  { %v1584_v12 = vld [vmem:[#allocation5 + $0x2a0] ss:$16 sps:$4 sm:$0xff]   ;;  %699 = vmatpush1.bf16.msra.mxu0 %v1577_v7  ;;  %v1585_v13 = vld [vmem:[#allocation5 + $0x84] ss:$16 sps:$4 sm:$0xff]   ;;  %v1629_v45 = vld [vmem:[#allocation5 + $0xa8] ss:$16 sps:$4 sm:$0xff]  }
  0x46   :  { %740 = vmatpush1.bf16.msra.mxu1 %v1578_v8  ;;  %700 = vmatprep.subr.bf16.mxu0 %v1579_v9  ;;  %v1587_v14 = vld [vmem:[#allocation5 + $0x284] ss:$16 sps:$4 sm:$0xff]   ;;  %v1589_v15 = vld [vmem:[#allocation5 + $0x80] ss:$16 sps:$4 sm:$0xff]   ;;  %v1637_v48 = vld [vmem:[#allocation5 + $0x8c] ss:$16 sps:$4 sm:$0xff]  }
  0x47   :  { %741 = vmatprep.subr.bf16.mxu1 %v1581_v10  ;;  %v1590_v16 = vld [vmem:[#allocation5 + $0x280] ss:$16 sps:$4 sm:$0xff]   ;;  %v1591_v17 = vld [vmem:[#allocation5 + $0x64] ss:$16 sps:$4 sm:$0xff]   ;;  %v1635_v49 = vld [vmem:[#allocation5 + $0x88] ss:$16 sps:$4 sm:$0xff]  }
  0x48   :  { %v1593_v18 = vld [vmem:[#allocation5 + $0x264] ss:$16 sps:$4 sm:$0xff]   ;;  %v1595_v19 = vld [vmem:[#allocation5 + $0x60] ss:$16 sps:$4 sm:$0xff]   ;;  %v1643_v54 = vld [vmem:[#allocation5 + $0x6c] ss:$16 sps:$4 sm:$0xff]  }
  0x49   :  { %701 = vmatpush1.bf16.msra.mxu0 %v1583_v11  ;;  %v1596_v20 = vld [vmem:[#allocation5 + $0x260] ss:$16 sps:$4 sm:$0xff]   ;;  %v1597_v21 = vld [vmem:[#allocation5 + $0x44] ss:$16 sps:$4 sm:$0xff]   ;;  %v1641_v55 = vld [vmem:[#allocation5 + $0x68] ss:$16 sps:$4 sm:$0xff]  }
  0x4a   :  { %742 = vmatpush1.bf16.msra.mxu1 %v1584_v12  ;;  %702 = vmatprep.subr.bf16.mxu0 %v1585_v13  ;;  %v1599_v22 = vld [vmem:[#allocation5 + $0x244] ss:$16 sps:$4 sm:$0xff]   ;;  %v1601_v23 = vld [vmem:[#allocation5 + $0x40] ss:$16 sps:$4 sm:$0xff]   ;;  %v1649_v58 = vld [vmem:[#allocation5 + $0x4c] ss:$16 sps:$4 sm:$0xff]  }
  0x4b   :  { %743 = vmatprep.subr.bf16.mxu1 %v1587_v14  ;;  %v1602_v24 = vld [vmem:[#allocation5 + $0x240] ss:$16 sps:$4 sm:$0xff]   ;;  %v1603_v25 = vld [vmem:[#allocation5 + $0x24] ss:$16 sps:$4 sm:$0xff]   ;;  %v1647_v59 = vld [vmem:[#allocation5 + $0x48] ss:$16 sps:$4 sm:$0xff]  }
  0x4c   :  { %v1605_v26 = vld [vmem:[#allocation5 + $0x224] ss:$16 sps:$4 sm:$0xff]   ;;  %v1607_v27 = vld [vmem:[#allocation5 + $0x20] ss:$16 sps:$4 sm:$0xff]   ;;  %v1655_v62 = vld [vmem:[#allocation5 + $0x2c] ss:$16 sps:$4 sm:$0xff]  }
  0x4d   :  { %703 = vmatpush1.bf16.msra.mxu0 %v1589_v15  ;;  %v1608_v28 = vld [vmem:[#allocation5 + $0x220] ss:$16 sps:$4 sm:$0xff]   ;;  %v1609_v29 = vld [vmem:[#allocation5 + $0x4] ss:$16 sps:$4 sm:$0xff]   ;;  %v1653_v63 = vld [vmem:[#allocation5 + $0x28] ss:$16 sps:$4 sm:$0xff]  }
  0x4e   :  { %744 = vmatpush1.bf16.msra.mxu1 %v1590_v16  ;;  %704 = vmatprep.subr.bf16.mxu0 %v1591_v17  ;;  %v1611_v30 = vld [vmem:[#allocation5 + $0x204] ss:$16 sps:$4 sm:$0xff]   ;;  %v1613_v31 = vld [vmem:[#allocation5] ss:$16 sps:$4 sm:$0xff]   ;;  %v1661_v3 = vld [vmem:[#allocation5 + $0xc] ss:$16 sps:$4 sm:$0xff]  }
  0x4f   :  { %745 = vmatprep.subr.bf16.mxu1 %v1593_v18  ;;  %v1614_v32 = vld [vmem:[#allocation5 + $0x200] ss:$16 sps:$4 sm:$0xff]   ;;  %v1615_v34 = vld [vmem:[#allocation5 + $0x1e4] ss:$16 sps:$4 sm:$0xff]   ;;  %v1659_v4 = vld [vmem:[#allocation5 + $0x8] ss:$16 sps:$4 sm:$0xff]  }
  0x50   :  { %v1620_v38 = vld [vmem:[#allocation5 + $0x1e0] ss:$16 sps:$4 sm:$0xff]   ;;  %v1621_v39 = vld [vmem:[#allocation5 + $0x1c4] ss:$16 sps:$4 sm:$0xff]   ;;  %v92_v6 = vld [vmem:[#allocation2] sm:$0xff]  ;;  %vm1890_vm0 = vmmov 0  }
  0x51   :  { %705 = vmatpush1.bf16.msra.mxu0 %v1595_v19  ;;  %v1626_v42 = vld [vmem:[#allocation5 + $0x1c0] ss:$16 sps:$4 sm:$0xff]   ;;  %v1627_v43 = vld [vmem:[#allocation5 + $0x1a4] ss:$16 sps:$4 sm:$0xff]   ;;  %v1665_v7 = vld [vmem:[#allocation5 + $0x1ec] ss:$16 sps:$4 sm:$0xff]   ;;  %v1957_v9 = vpack.c.bf16 %v92_v6, %v92_v6 }
  0x52   :  { %746 = vmatpush1.bf16.msra.mxu1 %v1596_v20  ;;  %706 = vmatprep.subr.bf16.mxu0 %v1597_v21  ;;  %v1632_v46 = vld [vmem:[#allocation5 + $0x1a0] ss:$16 sps:$4 sm:$0xff]   ;;  %v1633_v47 = vld [vmem:[#allocation5 + $0x184] ss:$16 sps:$4 sm:$0xff]   ;;  %v1668_v8 = vld [vmem:[#allocation5 + $0x2ec] ss:$16 sps:$4 sm:$0xff]  }
  0x53   :  { %747 = vmatprep.subr.bf16.mxu1 %v1599_v22  ;;  %v93_v50 = vld [vmem:[#allocation2 + $0x8] sm:$0xff]  ;;  %v1663_v10 = vld [vmem:[#allocation5 + $0x1e8] ss:$16 sps:$4 sm:$0xff]   ;;  %v1671_v12 = vld [vmem:[#allocation5 + $0x1cc] ss:$16 sps:$4 sm:$0xff]   ;;  %s1891_s29 = smov [#allocation11]  }
  0x54   :  { %v1638_v51 = vld [vmem:[#allocation5 + $0x180] ss:$16 sps:$4 sm:$0xff]   ;;  %v1639_v52 = vld [vmem:[#allocation5 + $0x164] ss:$16 sps:$4 sm:$0xff]   ;;  %v96_v53 = vpack.c.bf16 %v93_v50, %v93_v50  ;;  %v1666_v11 = vld [vmem:[#allocation5 + $0x2e8] ss:$16 sps:$4 sm:$0xff]  }
  0x55   :  { %707 = vmatpush1.bf16.msra.mxu0 %v1601_v23  ;;  %v1644_v56 = vld [vmem:[#allocation5 + $0x160] ss:$16 sps:$4 sm:$0xff]   ;;  %v1645_v57 = vld [vmem:[#allocation5 + $0x144] ss:$16 sps:$4 sm:$0xff]   ;;  %v1674_v13 = vld [vmem:[#allocation5 + $0x2cc] ss:$16 sps:$4 sm:$0xff]  }
  0x56   :  { %748 = vmatpush1.bf16.msra.mxu1 %v1602_v24  ;;  %708 = vmatprep.subr.bf16.mxu0 %v1603_v25  ;;  %v1650_v60 = vld [vmem:[#allocation5 + $0x140] ss:$16 sps:$4 sm:$0xff]   ;;  %v1651_v61 = vld [vmem:[#allocation5 + $0x124] ss:$16 sps:$4 sm:$0xff]   ;;  %v1669_v14 = vld [vmem:[#allocation5 + $0x1c8] ss:$16 sps:$4 sm:$0xff]  }
  0x57   :  { %749 = vmatprep.subr.bf16.mxu1 %v1605_v26  ;;  %728 = vmatprep.mubr.bf16.mxu0 %v96_v53  ;;  %v1656_v1 = vld [vmem:[#allocation5 + $0x120] ss:$16 sps:$4 sm:$0xff]   ;;  %v1657_v2 = vld [vmem:[#allocation5 + $0x104] ss:$16 sps:$4 sm:$0xff]   ;;  %v1672_v15 = vld [vmem:[#allocation5 + $0x2c8] ss:$16 sps:$4 sm:$0xff]  }
  0x58   :  { %v1662_v5 = vld [vmem:[#allocation5 + $0x100] ss:$16 sps:$4 sm:$0xff]   ;;  %v1677_v16 = vld [vmem:[#allocation5 + $0x1ac] ss:$16 sps:$4 sm:$0xff]   ;;  %v1675_v18 = vld [vmem:[#allocation5 + $0x1a8] ss:$16 sps:$4 sm:$0xff]  }
  0x59   :  { %709 = vmatpush1.bf16.msra.mxu0 %v1607_v27  ;;  %v1680_v17 = vld [vmem:[#allocation5 + $0x2ac] ss:$16 sps:$4 sm:$0xff]   ;;  %v1678_v19 = vld [vmem:[#allocation5 + $0x2a8] ss:$16 sps:$4 sm:$0xff]   ;;  %s1332_s30 = sshll.u32 %s1891_s29, 4  ;;  %s1333_s30 = int_to_ptr.vmem [resolvable:$true] %s1332_s30 }
  0x5a   :  { %750 = vmatpush1.bf16.msra.mxu1 %v1608_v28  ;;  %710 = vmatprep.subr.bf16.mxu0 %v1609_v29  ;;  %v1683_v20 = vld [vmem:[#allocation5 + $0x18c] ss:$16 sps:$4 sm:$0xff]   ;;  %v1681_v22 = vld [vmem:[#allocation5 + $0x188] ss:$16 sps:$4 sm:$0xff]   ;;  %p1856_p12 = scmp.lt.s32.totalorder %s1333_s30, %s1333_s30 }
  0x5b   :  { %751 = vmatprep.subr.bf16.mxu1 %v1611_v30  ;;  %v1686_v21 = vld [vmem:[#allocation5 + $0x28c] ss:$16 sps:$4 sm:$0xff]   ;;  %v1684_v23 = vld [vmem:[#allocation5 + $0x288] ss:$16 sps:$4 sm:$0xff]  }
  0x5c   :  { %v1689_v24 = vld [vmem:[#allocation5 + $0x16c] ss:$16 sps:$4 sm:$0xff]   ;;  %v1687_v26 = vld [vmem:[#allocation5 + $0x168] ss:$16 sps:$4 sm:$0xff]  }
  0x5d   :  { %711 = vmatpush1.bf16.msra.mxu0 %v1613_v31  ;;  %v1692_v25 = vld [vmem:[#allocation5 + $0x26c] ss:$16 sps:$4 sm:$0xff]   ;;  %v1690_v27 = vld [vmem:[#allocation5 + $0x268] ss:$16 sps:$4 sm:$0xff]  }
  0x5e   :  { %752 = vmatpush1.bf16.msra.mxu1 %v1614_v32  ;;  %712 = vmatprep.subr.bf16.mxu0 %v1615_v34  ;;  %v1695_v28 = vld [vmem:[#allocation5 + $0x14c] ss:$16 sps:$4 sm:$0xff]   ;;  %v1696_v30 = vld [vmem:[#allocation5 + $0x248] ss:$16 sps:$4 sm:$0xff]  }
  0x5f   :  { %778 = vmatprep.subr.bf16.mxu1 %v1619_v35  ;;  %v1698_v29 = vld [vmem:[#allocation5 + $0x24c] ss:$16 sps:$4 sm:$0xff]   ;;  %v1699_v33 = vld [vmem:[#allocation5 + $0x128] ss:$16 sps:$4 sm:$0xff]  }
  0x60   :  { %v1701_v31 = vld [vmem:[#allocation5 + $0x12c] ss:$16 sps:$4 sm:$0xff]   ;;  %v1702_v34 = vld [vmem:[#allocation5 + $0x228] ss:$16 sps:$4 sm:$0xff]  }
  0x61   :  { %770 = vmatmul.mubr.bf16.vlgmr.msra.gmra.mxu1 %v1954_v36  ;;  %713 = vmatpush2.bf16.msra.mxu0 %v1620_v38  ;;  %v1704_v32 = vld [vmem:[#allocation5 + $0x22c] ss:$16 sps:$4 sm:$0xff]   ;;  %v1705_v38 = vld [vmem:[#allocation5 + $0x108] ss:$16 sps:$4 sm:$0xff]  }
  0x62   :  { %779 = vmatpush1.bf16.msra.mxu1 %v1617_v37  ;;  %714 = vmatprep.subr.bf16.mxu0 %v1621_v39  ;;  %v1707_v35 = vld [vmem:[#allocation5 + $0x10c] ss:$16 sps:$4 sm:$0xff]   ;;  %v1708_v39 = vld [vmem:[#allocation5 + $0x208] ss:$16 sps:$4 sm:$0xff]  }
  0x63   :  { %780 = vmatprep.subr.bf16.mxu1 %v1625_v40  ;;  %810 = vmatprep.mubr.bf16.mxu1 %v96_v53  ;;  %v1710_v37 = vld [vmem:[#allocation5 + $0x20c] ss:$16 sps:$4 sm:$0xff]   ;;  %v1722_v50 = vld [vmem:[#allocation8 + $0x10] sm:$0xff]   ;;  %v1725_v53 = vld [vmem:[#allocation8 + $0x40] sm:$0xff]  }
  0x64   :  { %v1711_v40 = vld [vmem:[#allocation8 + $0x78] sm:$0xff]   ;;  %v1741_v6 = vld [vmem:[#allocation8 + $0xc0] sm:$0xff]  }
  0x65   :  { %715 = vmatpush2.bf16.msra.mxu0 %v1626_v42  ;;  %v1713_v42 = vld [vmem:[#allocation8 + $0x70] sm:$0xff]  }
  0x66   :  { %781 = vmatpush1.bf16.msra.mxu1 %v1623_v41  ;;  %716 = vmatprep.subr.bf16.mxu0 %v1627_v43  ;;  %v1712_v41 = vld [vmem:[#allocation8 + $0x38] sm:$0xff]   ;;  %v1714_v43 = vld [vmem:[#allocation8 + $0x30] sm:$0xff]  }
  0x67   :  { %782 = vmatprep.subr.bf16.mxu1 %v1631_v44  ;;  %v1715_v44 = vld [vmem:[#allocation8 + $0x68] sm:$0xff]  }
  0x69   :  { %717 = vmatpush2.bf16.msra.mxu0 %v1632_v46  ;;  %v1717_v46 = vld [vmem:[#allocation8 + $0x60] sm:$0xff]  }
  0x6a   :  { %783 = vmatpush1.bf16.msra.mxu1 %v1629_v45  ;;  %718 = vmatprep.subr.bf16.mxu0 %v1633_v47  ;;  %v1716_v45 = vld [vmem:[#allocation8 + $0x28] sm:$0xff]   ;;  %v1718_v47 = vld [vmem:[#allocation8 + $0x20] sm:$0xff]  }
  0x6b   :  { %784 = vmatprep.subr.bf16.mxu1 %v1637_v48  ;;  %v1719_v48 = vld [vmem:[#allocation8 + $0x58] sm:$0xff]  }
  0x6d   :  { %719 = vmatpush2.bf16.msra.mxu0 %v1638_v51  ;;  %v1723_v51 = vld [vmem:[#allocation8 + $0x48] sm:$0xff]  }
  0x6e   :  { %785 = vmatpush1.bf16.msra.mxu1 %v1635_v49  ;;  %720 = vmatprep.subr.bf16.mxu0 %v1639_v52  ;;  %v1720_v49 = vld [vmem:[#allocation8 + $0x18] sm:$0xff]   ;;  %v1724_v52 = vld [vmem:[#allocation8 + $0x8] sm:$0xff]  }
  0x6f   :  { %786 = vmatprep.subr.bf16.mxu1 %v1643_v54  ;;  %v1726_v54 = vld [vmem:[#allocation8] sm:$0xff]  }
  0x71   :  { %721 = vmatpush2.bf16.msra.mxu0 %v1644_v56  ;;  %v1728_v56 = vld [vmem:[#allocation8 + $0xb8] sm:$0xff]  }
  0x72   :  { %787 = vmatpush1.bf16.msra.mxu1 %v1641_v55  ;;  %722 = vmatprep.subr.bf16.mxu0 %v1645_v57  ;;  %v1727_v55 = vld [vmem:[#allocation8 + $0xf8] sm:$0xff]   ;;  %v1729_v57 = vld [vmem:[#allocation8 + $0xf0] sm:$0xff]  }
  0x73   :  { %788 = vmatprep.subr.bf16.mxu1 %v1649_v58  ;;  %v1730_v58 = vld [vmem:[#allocation8 + $0xb0] sm:$0xff]  }
  0x75   :  { %723 = vmatpush2.bf16.msra.mxu0 %v1650_v60  ;;  %v1732_v60 = vld [vmem:[#allocation8 + $0xa8] sm:$0xff]  }
  0x76   :  { %789 = vmatpush1.bf16.msra.mxu1 %v1647_v59  ;;  %724 = vmatprep.subr.bf16.mxu0 %v1651_v61  ;;  %v1731_v59 = vld [vmem:[#allocation8 + $0xe8] sm:$0xff]   ;;  %v1733_v61 = vld [vmem:[#allocation8 + $0xe0] sm:$0xff]  }
  0x77   :  { %790 = vmatprep.subr.bf16.mxu1 %v1655_v62  ;;  %v1734_v62 = vld [vmem:[#allocation8 + $0xa0] sm:$0xff]  }
  0x79   :  { %725 = vmatpush2.bf16.msra.mxu0 %v1656_v1  ;;  %v1736_v1 = vld [vmem:[#allocation8 + $0x98] sm:$0xff]  }
  0x7a   :  { %791 = vmatpush1.bf16.msra.mxu1 %v1653_v63  ;;  %726 = vmatprep.subr.bf16.mxu0 %v1657_v2  ;;  %v1735_v63 = vld [vmem:[#allocation8 + $0xd8] sm:$0xff]   ;;  %v1737_v2 = vld [vmem:[#allocation8 + $0xd0] sm:$0xff]  }
  0x7b   :  { %792 = vmatprep.subr.bf16.mxu1 %v1661_v3  ;;  %v1738_v3 = vld [vmem:[#allocation8 + $0x90] sm:$0xff]  }
  0x7d   :  { %727 = vmatpush2.bf16.msra.mxu0 %v1662_v5  ;;  %v1740_v5 = vld [vmem:[#allocation8 + $0x88] sm:$0xff]  }
  0x7e   :  { %793 = vmatpush1.bf16.msra.mxu1 %v1659_v4  ;;  %819 = vmatprep.subr.bf16.mxu0 %v1668_v8  ;;  %v1739_v4 = vld [vmem:[#allocation8 + $0xc8] sm:$0xff]  }
  0x7f   :  { %794 = vmatprep.subr.bf16.mxu1 %v1665_v7  ;;  %v1742_v7 = vld [vmem:[#allocation8 + $0x80] sm:$0xff]  }
  0x80   :  { %729 = vmatmul.mubr.bf16.vlgmr.msra.gmra.mxu0 %v1957_v9 }
  0x81   :  { %820 = vmatpush1.bf16.msra.mxu0 %v1666_v11  ;;  %851 = vmatprep.mubr.bf16.mxu0 %v1888_v0  ;;  %v1693_v0 = vld [vmem:[#allocation5 + $0x148] ss:$16 sps:$4 sm:$0xff]  }
  0x82   :  { %795 = vmatpush2.bf16.msra.mxu1 %v1663_v10  ;;  %821 = vmatprep.subr.bf16.mxu0 %v1674_v13 }
  0x83   :  { %796 = vmatprep.subr.bf16.mxu1 %v1671_v12  ;;  %v196_v12 = vlaneseq }
  0x85   :  { %822 = vmatpush1.bf16.msra.mxu0 %v1672_v15  ;;  %v197_v13 = vshrl.u32 %v196_v12, 7  ;;  %v194_v15 = vld [vmem:[#allocation7] sm:$0xf] }
  0x86   :  { %797 = vmatpush2.bf16.msra.mxu1 %v1669_v14  ;;  %823 = vmatprep.subr.bf16.mxu0 %v1680_v17 }
  0x87   :  { %798 = vmatprep.subr.bf16.mxu1 %v1677_v16  ;;  %v198_v14 = vsub.s32 0, %v197_v13  ;;  %v202_v16 = vsub.s32 1, %v197_v13 }
  0x89   :  { %824 = vmatpush1.bf16.msra.mxu0 %v1678_v19  ;;  %v199_v17 = vrot.slane %v194_v15, %v198_v14 }
  0x8a   :  { %799 = vmatpush2.bf16.msra.mxu1 %v1675_v18  ;;  %825 = vmatprep.subr.bf16.mxu0 %v1686_v21  ;;  %v203_v18 = vrot.slane %v194_v15, %v202_v16 }
  0x8b   :  { %800 = vmatprep.subr.bf16.mxu1 %v1683_v20 }
  0x8d   :  { %826 = vmatpush1.bf16.msra.mxu0 %v1684_v23 }
  0x8e   :  { %801 = vmatpush2.bf16.msra.mxu1 %v1681_v22  ;;  %827 = vmatprep.subr.bf16.mxu0 %v1692_v25 }
  0x8f   :  { %802 = vmatprep.subr.bf16.mxu1 %v1689_v24 }
  0x91   :  { %828 = vmatpush1.bf16.msra.mxu0 %v1690_v27 }
  0x92   :  { %803 = vmatpush2.bf16.msra.mxu1 %v1687_v26  ;;  %829 = vmatprep.subr.bf16.mxu0 %v1698_v29 }
  0x93   :  { %804 = vmatprep.subr.bf16.mxu1 %v1695_v28 }
  0x95   :  { %830 = vmatpush1.bf16.msra.mxu0 %v1696_v30  ;;  %v206_v30 = vsub.s32 2, %v197_v13 }
  0x96   :  { %805 = vmatpush2.bf16.msra.mxu1 %v1693_v0  ;;  %831 = vmatprep.subr.bf16.mxu0 %v1704_v32 }
  0x97   :  { %806 = vmatprep.subr.bf16.mxu1 %v1701_v31  ;;  %v210_v31 = vsub.s32 3, %v197_v13  ;;  %v207_v32 = vrot.slane %v194_v15, %v206_v30 }
  0x99   :  { %832 = vmatpush1.bf16.msra.mxu0 %v1702_v34 }
  0x9a   :  { %807 = vmatpush2.bf16.msra.mxu1 %v1699_v33  ;;  %833 = vmatprep.subr.bf16.mxu0 %v1710_v37  ;;  %v211_v33 = vrot.slane %v194_v15, %v210_v31 }
  0x9b   :  { %808 = vmatprep.subr.bf16.mxu1 %v1707_v35 }
  0x9d   :  { %834 = vmatpush1.bf16.msra.mxu0 %v1708_v39 }
  0x9e   :  { %809 = vmatpush2.bf16.msra.mxu1 %v1705_v38  ;;  %1481 = vmatprep.subr.bf16.mxu0 %v1711_v40 }
  0x9f   :  { %1503 = vmatprep.subr.bf16.mxu1 %v1727_v55  ;;  %v1747_v55 = vld [vmem:[#allocation10 + $0x18] sm:$0xff]  }
  0xa0   :  { %852 = vmatmul.mubr.bf16.vlgmr.msra.gmra.mxu0 %v1954_v36  ;;  %v1721_v36 = vld [vmem:[#allocation8 + $0x50] sm:$0xff]  }
  0xa1   :  { %811 = vmatmul.mubr.bf16.vlgmr.msra.gmra.mxu1 %v1957_v9  ;;  %1482 = vmatpush3.bf16.msra.mxu0 %v1712_v41 }
  0xa2   :  { %1483 = vmatprep.subr.bf16.mxu0 %v1713_v42  ;;  %1504 = vmatpush3.bf16.msra.mxu1 %v1728_v56  ;;  %v1748_v56 = vld [vmem:[#allocation10 + $0x10] sm:$0xff]  }
  0xa3   :  { %1505 = vmatprep.subr.bf16.mxu1 %v1729_v57  ;;  %v1749_v57 = vld [vmem:[#allocation10 + $0x8] sm:$0xff]  }
  0xa5   :  { %1484 = vmatpush3.bf16.msra.mxu0 %v1714_v43 }
  0xa6   :  { %1485 = vmatprep.subr.bf16.mxu0 %v1715_v44  ;;  %1506 = vmatpush3.bf16.msra.mxu1 %v1730_v58  ;;  %v1750_v58 = vld [vmem:[#allocation10] sm:$0xff]  }
  0xa7   :  { %1507 = vmatprep.subr.bf16.mxu1 %v1731_v59 }
  0xa9   :  { %1486 = vmatpush3.bf16.msra.mxu0 %v1716_v45 }
  0xaa   :  { %1487 = vmatprep.subr.bf16.mxu0 %v1717_v46  ;;  %1508 = vmatpush3.bf16.msra.mxu1 %v1732_v60 }
  0xab   :  { %1509 = vmatprep.subr.bf16.mxu1 %v1733_v61 }
  0xad   :  { %1488 = vmatpush3.bf16.msra.mxu0 %v1718_v47 }
  0xae   :  { %1489 = vmatprep.subr.bf16.mxu0 %v1719_v48  ;;  %1510 = vmatpush3.bf16.msra.mxu1 %v1734_v62 }
  0xaf   :  { %1511 = vmatprep.subr.bf16.mxu1 %v1735_v63 }
  0xb1   :  { %1490 = vmatpush3.bf16.msra.mxu0 %v1720_v49 }
  0xb2   :  { %1491 = vmatprep.subr.bf16.mxu0 %v1721_v36  ;;  %1512 = vmatpush3.bf16.msra.mxu1 %v1736_v1  ;;  %v1439_v1 = vld [vmem:[%s1976_s4] ss:$0 sm:$0xff]  ;;  %s1851_s4 = scalar_lea.vmem %s1333_s30, 64 }
  0xb3   :  { %1513 = vmatprep.subr.bf16.mxu1 %v1737_v2  ;;  %p1852_p11 = scmp.ne.s32.totalorder %s1333_s30, %s1851_s4  ;;  %p1857_p13 = scmp.lt.s32.totalorder %s1851_s4, %s1851_s4 }
  0xb5   :  { %1492 = vmatpush3.bf16.msra.mxu0 %v1722_v50  ;;  %v1743_v50 = vld [vmem:[#allocation10 + $0x38] sm:$0xff]   ;;  %p1858_p0 = por %p1857_p13, %p1856_p12 }
  0xb6   :  { %1493 = vmatprep.subr.bf16.mxu0 %v1723_v51  ;;  %1514 = vmatpush3.bf16.msra.mxu1 %v1738_v3  ;;  %v1889_v51 = vmov 0.0  }
  0xb7   :  { %1515 = vmatprep.subr.bf16.mxu1 %v1739_v4  ;;  %p1859_p1 = pnand %p1858_p0, %p1852_p11 }
  0xb9   :  { %1494 = vmatpush3.bf16.msra.mxu0 %v1724_v52  ;;  %v1744_v52 = vld [vmem:[#allocation10 + $0x30] sm:$0xff]  }
  0xba   :  { %1495 = vmatprep.subr.bf16.mxu0 %v1725_v53  ;;  %1516 = vmatpush3.bf16.msra.mxu1 %v1740_v5  ;;  %v1745_v53 = vld [vmem:[#allocation10 + $0x28] sm:$0xff]  }
  0xbb   :  { %1517 = vmatprep.subr.bf16.mxu1 %v1741_v6 }
  0xbd   :  { %1496 = vmatpush3.bf16.msra.mxu0 %v1726_v54  ;;  %v1746_v54 = vld [vmem:[#allocation10 + $0x20] sm:$0xff]  }
  0xbe   :  { %1518 = vmatpush3.bf16.msra.mxu1 %v1742_v7  ;;  %1534 = vmatprep.subr.bf16.mxu0 %v1889_v51 }
 0x121   :  { %v771_v8 = vpop.f32.mrf.mxu1 }
 0x123   :  { %v773_v9 = vpop.f32.mrf.mxu1 }
 0x125   :  { %v775_v10 = vpop.f32.mrf.mxu1 }
 0x127   :  { %v776_v11 = vpop.f32.mrf.mxu1 }
 0x128   :  { %v1472_v11 = vld [vmem:[%s1978_s6] ss:$0 sm:$0xff] }
 0x140   :  { %v730_v19 = vpop.f32.mrf.mxu0 }
 0x141   :  { %v731_v20 = vadd.f32 %v730_v19, %v199_v17 }
 0x142   :  { %v732_v21 = vpop.f32.mrf.mxu0 }
 0x143   :  { %v772_v22 = vadd.f32 %v771_v8, %v731_v20  ;;  %v733_v23 = vadd.f32 %v732_v21, %v203_v18 }
 0x144   :  { %v734_v24 = vpop.f32.mrf.mxu0 }
 0x145   :  { %v774_v25 = vadd.f32 %v773_v9, %v733_v23  ;;  %v860_v26 = vmax.f32 %v772_v22, 0.0 }
 0x146   :  { %v735_v27 = vpop.f32.mrf.mxu0 }
 0x147   :  { %v861_v28 = vmax.f32 %v774_v25, 0.0  ;;  %v864_v0 = vpack.c.bf16 %v860_v26, %v860_v26 }
 0x149   :  { %v865_v29 = vpack.c.bf16 %v861_v28, %v861_v28 }
 0x14b   :  { %1163 = vmatprep.mubr.bf16.mxu0 %v865_v29 }
 0x14c   :  { %1164 = vmatmul.mubr.bf16.vlgmr.msra.gmra.mxu0 %v864_v0 }
 0x14d   :  { %1535 = vmatpush3.bf16.msra.mxu0 %v1743_v50  ;;  %1550 = vmatprep.mubr.msk.bf16.mxu0 %vm1890_vm0, %v1889_v51 }
 0x14e   :  { %1536 = vmatprep.subr.bf16.mxu0 %v1889_v51 }
 0x151   :  { %1537 = vmatpush3.bf16.msra.mxu0 %v1744_v52 }
 0x152   :  { %1538 = vmatprep.subr.bf16.mxu0 %v1889_v51 }
 0x155   :  { %1539 = vmatpush3.bf16.msra.mxu0 %v1745_v53 }
 0x156   :  { %1540 = vmatprep.subr.bf16.mxu0 %v1889_v51 }
 0x159   :  { %1541 = vmatpush3.bf16.msra.mxu0 %v1746_v54 }
 0x15a   :  { %1542 = vmatprep.subr.bf16.mxu0 %v1889_v51 }
 0x15d   :  { %1543 = vmatpush3.bf16.msra.mxu0 %v1747_v55 }
 0x15e   :  { %1544 = vmatprep.subr.bf16.mxu0 %v1889_v51 }
 0x160   :  { %v853_v35 = vpop.f32.mrf.mxu0 }
 0x161   :  { %v812_v34 = vpop.f32.mrf.mxu1  ;;  %1545 = vmatpush3.bf16.msra.mxu0 %v1748_v56 }
 0x162   :  { %v813_v37 = vadd.f32 %v812_v34, %v207_v32  ;;  %v855_v39 = vpop.f32.mrf.mxu0  ;;  %1546 = vmatprep.subr.bf16.mxu0 %v1889_v51 }
 0x163   :  { %v814_v38 = vpop.f32.mrf.mxu1 }
 0x164   :  { %v854_v40 = vadd.f32 %v853_v35, %v813_v37  ;;  %v815_v41 = vadd.f32 %v814_v38, %v211_v33  ;;  %v857_v43 = vpop.f32.mrf.mxu0 }
 0x165   :  { %v816_v42 = vpop.f32.mrf.mxu1  ;;  %1547 = vmatpush3.bf16.msra.mxu0 %v1749_v57 }
 0x166   :  { %v856_v44 = vadd.f32 %v855_v39, %v815_v41  ;;  %v862_v45 = vmax.f32 %v854_v40, 0.0  ;;  %v858_v47 = vpop.f32.mrf.mxu0  ;;  %1548 = vmatprep.subr.bf16.mxu0 %v1889_v51 }
 0x167   :  { %v817_v46 = vpop.f32.mrf.mxu1 }
 0x168   :  { %v863_v48 = vmax.f32 %v856_v44, 0.0  ;;  %v866_v36 = vpack.c.bf16 %v862_v45, %v862_v45 }
 0x169   :  { %1549 = vmatpush3.bf16.msra.mxu0 %v1750_v58 }
 0x16a   :  { %v867_v49 = vpack.c.bf16 %v863_v48, %v863_v48 }
 0x16c   :  { %1203 = vmatprep.mubr.bf16.mxu1 %v867_v49 }
 0x16d   :  { %1204 = vmatmul.mubr.bf16.vlgmr.msra.gmra.mxu1 %v866_v36 }
 0x20c   :  { %v1497_v59 = vpop.f32.mrf.mxu0 }
 0x20e   :  { %v1498_v60 = vpop.f32.mrf.mxu0 }
 0x20f   :  { %v1499_v63 = vadd.f32 %v1498_v60, %v1497_v59 }
 0x210   :  { %v1500_v61 = vpop.f32.mrf.mxu0 }
 0x211   :  { %v1166_v4 = vadd.f32 %v1499_v63, %v1439_v1 }
 0x212   :  { %v1501_v62 = vpop.f32.mrf.mxu0 }
 0x22d   :  { %v1519_v2 = vpop.f32.mrf.mxu1 }
 0x22f   :  { %v1520_v3 = vpop.f32.mrf.mxu1 }
 0x230   :  { %v1521_v5 = vadd.f32 %v1520_v3, %v1519_v2 }
 0x231   :  { %v1522_v6 = vpop.f32.mrf.mxu1 }
 0x232   :  { %v1206_v7 = vadd.f32 %v1521_v5, %v1166_v4 }
 0x233   :  { %v1523_v8 = vpop.f32.mrf.mxu1 }
 0x234   :  { %v1211_v9 = vmax.f32 %v1206_v7, 0.0 }
 0x236   :  { %v1212_v10 = vpack.c.bf16 %v1211_v9, %v1211_v9 }
 0x238   :  { %1551 = vmatmul.mubr.bf16.vlgmr.msra.gmra.mxu0 %v1212_v10 }
 0x2f8   :  { %v1318_v12 = vpop.f32.mrf.mxu0 }
 0x2f9   :  { %v1319_v13 = vadd.f32 %v1472_v11, %v1318_v12 }
 0x2fa   :  { %v1552_v14 = vpop.f32.mrf.mxu0 }
 0x2fb   :  { %v1324_v15 = vpack.c.bf16 %v1319_v13, %v1319_v13 }
 0x2fc   :  { %v1321_v16 = vpop.f32.mrf.mxu0 }
 0x2fd   :  { %1325 = vst [vmem:[#allocation11] sm:$0xf] %v1324_v15 }
 0x2fe   :  { %v1553_v17 = vpop.f32.mrf.mxu0 }
 0x2ff   :  { %1862 = shalt.err (!%p1859_p1)
}
 0x300   :  { %1335 = dma.vmem_to_hbm [thread:$0]  %s1333_s30, 64, %s1979_s7, [#allocation4]  }
 0x301   :  { %1877 = dma.done.wait [#allocation4], 64  }
 0x302   :  { %1878 = vsyncadd [#allocation4], 4294967232 }
 0x303   :  { %1339 = vsyncpa [#allocation3], 1 }
 0x304   :  { %1340 = vsyncpa [#allocation6], 1 }
 0x305   :  { %1341 = vsyncpa [#allocation9], 1 }
 0x306   :  { %1342 = vsyncpa [#allocation4], 1 }

</bundles_post_ra>
